<compile_context>
chip_gen: v5e
topology: v5e:2x2
jax: 0.10.0
libtpu: 0.0.40
codegen_flags: <defaults>
</compile_context>

<pallas_src>
import jax
import jax.numpy as jnp
import numpy as np
from jax.experimental import pallas as pl
from jax.experimental.pallas import tpu as pltpu

NUM_NODES = 16
NUM_FEATURES = 8
HIDDEN = 32
NUM_LAYERS = 5


def gnn_kernel(a_ref, x_ref, wr_ref, wl_ref, b_ref, out_ref):
    """Whole 5-layer GNN forward on VMEM-resident tiles.

    a_ref  : [N, N]        dense adjacency (A[i, j] = #edges j->i)
    x_ref  : [N, 32]       node features zero-padded from 8 -> 32 columns
    wr_ref : [5, 32, 32]   per-layer W_rel  (layer 0 rows 8..31 are zero)
    wl_ref : [5, 32, 32]   per-layer W_root (layer 0 rows 8..31 are zero)
    b_ref  : [5, 32]       per-layer bias
    """
    A = a_ref[...]

    def gconv(X, li):
        # neighbor aggregation (sum over incoming edges) on the MXU
        agg = jnp.dot(A, X, preferred_element_type=jnp.float32)            # [N, 32]
        h = (jnp.dot(agg, wr_ref[li], preferred_element_type=jnp.float32)
             + jnp.dot(X, wl_ref[li], preferred_element_type=jnp.float32)
             + b_ref[li:li + 1, :])
        return h

    x0 = x_ref[...]
    x1 = jax.nn.relu(gconv(x0, 0))
    x2 = jax.nn.relu(gconv(x1, 1)) + x1
    x3 = jax.nn.relu(gconv(x2, 2)) + x2
    x4 = jax.nn.relu(gconv(x3, 3)) + x3
    x5 = gconv(x4, 4) + x4
    out_ref[...] = x5


def init_params(key, num_features, hidden):
    """Deterministic params: 5 GraphConv layers.

    Each layer: W_rel [in, out], W_root [in, out], bias [1, out]
    (PyTorch Linear stores [out, in]; we keep the transpose for X @ W.)
    """
    dims = [(num_features, hidden)] + [(hidden, hidden)] * 4
    params = []
    for fin, fout in dims:
        k1, k2, k3, key = jax.random.split(key, 4)
        scale = 1.0 / np.sqrt(fin)
        wr = jax.random.uniform(k1, (fin, fout), jnp.float32, -scale, scale)
        wl = jax.random.uniform(k2, (fin, fout), jnp.float32, -scale, scale)
        b = jax.random.uniform(k3, (1, fout), jnp.float32, -scale, scale)
        params.append((wr, wl, b))
    return params


def pack_params(params):
    """One-time host-side packing into three small slabs (numpy, outside jit).

    wr_slab / wl_slab : [5, 32, 32]  (layer 0 input rows zero-padded 8 -> 32)
    b_slab            : [5, 32]
    """
    wr_slab = np.zeros((NUM_LAYERS, HIDDEN, HIDDEN), np.float32)
    wl_slab = np.zeros((NUM_LAYERS, HIDDEN, HIDDEN), np.float32)
    b_slab = np.zeros((NUM_LAYERS, HIDDEN), np.float32)
    for li, (wr, wl, b) in enumerate(params):
        fin, fout = wr.shape
        wr_slab[li, :fin, :fout] = np.asarray(wr)
        wl_slab[li, :fin, :fout] = np.asarray(wl)
        b_slab[li, :fout] = np.asarray(b[0])
    return jnp.asarray(wr_slab), jnp.asarray(wl_slab), jnp.asarray(b_slab)


def edge_index_to_adj(edge_index, num_nodes):
    # A[i, j] = number of edges j -> i  (edge_index[0] = src j, edge_index[1] = dst i)
    src = np.asarray(edge_index[0])
    dst = np.asarray(edge_index[1])
    A = np.zeros((num_nodes, num_nodes), np.float32)
    np.add.at(A, (dst, src), 1.0)
    return jnp.asarray(A)


@jax.jit
def gnn_forward(x, A, wr_slab, wl_slab, b_slab):
    """Jitted per-call path: only feature padding + the fused Pallas kernel."""
    num_nodes, num_features = x.shape
    x_pad = jnp.zeros((num_nodes, HIDDEN), jnp.float32).at[:, :num_features].set(x)

    vmem = pl.BlockSpec(memory_space=pltpu.MemorySpace.VMEM)
    out = pl.pallas_call(
        gnn_kernel,
        out_shape=jax.ShapeDtypeStruct((num_nodes, HIDDEN), jnp.float32),
        in_specs=[vmem, vmem, vmem, vmem, vmem],
        out_specs=vmem,
    )(A, x_pad, wr_slab, wl_slab, b_slab)
    return out


def gnn_reference(x, edge_index, params):
    """Pure-JAX reference (unfused, unpadded) for correctness checking."""
    src = edge_index[0]
    dst = edge_index[1]
    A = jnp.zeros((x.shape[0], x.shape[0]), jnp.float32).at[dst, src].add(1.0)

    def gconv(X, wr, wl, b):
        return (A @ X) @ wr + X @ wl + b

    x1 = jax.nn.relu(gconv(x, *params[0]))
    x2 = jax.nn.relu(gconv(x1, *params[1])) + x1
    x3 = jax.nn.relu(gconv(x2, *params[2])) + x2
    x4 = jax.nn.relu(gconv(x3, *params[3])) + x3
    x5 = gconv(x4, *params[4]) + x4
    return x5


if __name__ == "__main__":
    key = jax.random.PRNGKey(0)
    k_x, k_e, k_p = jax.random.split(key, 3)

    # node features
    x = jax.random.normal(k_x, (NUM_NODES, NUM_FEATURES), jnp.float32)
    # random directed edges, shape (2, E) like PyG edge_index
    num_edges = 40
    edge_index = jax.random.randint(k_e, (2, num_edges), 0, NUM_NODES, jnp.int32)

    params = init_params(k_p, NUM_FEATURES, HIDDEN)

    # One-time host-side preprocessing (hoisted out of the per-call jit path).
    A = edge_index_to_adj(edge_index, NUM_NODES)
    wr_slab, wl_slab, b_slab = pack_params(params)

    out = gnn_forward(x, A, wr_slab, wl_slab, b_slab)
    out = jax.block_until_ready(out)

    ref = gnn_reference(x, edge_index, params)
    np.testing.assert_allclose(np.asarray(out), np.asarray(ref),
                               rtol=1e-4, atol=1e-4)
    print("KERNEL_OK")
</pallas_src>

<mosaic_0001>
module attributes {stable_mosaic.version = 11 : i64} {
  func.func @gnn_kernel(%arg0: memref<16x16xf32, #tpu.memory_space<vmem>>, %arg1: memref<16x32xf32, #tpu.memory_space<vmem>>, %arg2: memref<5x32x32xf32, #tpu.memory_space<vmem>>, %arg3: memref<5x32x32xf32, #tpu.memory_space<vmem>>, %arg4: memref<5x32xf32, #tpu.memory_space<vmem>>, %arg5: memref<16x32xf32, #tpu.memory_space<vmem>>) attributes {dimension_semantics = [], scalar_prefetch = 0 : i64, scratch_operands = 0 : i64, tpu.core_type = #tpu.core_type<tc>} {
    %c0 = arith.constant 0 : index
    %c0_0 = arith.constant 0 : index
    %0 = vector.load %arg0[%c0, %c0_0] : memref<16x16xf32, #tpu.memory_space<vmem>>, vector<16x16xf32>
    %c0_1 = arith.constant 0 : index
    %c0_2 = arith.constant 0 : index
    %1 = vector.load %arg1[%c0_1, %c0_2] : memref<16x32xf32, #tpu.memory_space<vmem>>, vector<16x32xf32>
    %cst = arith.constant dense<0.000000e+00> : vector<16x32xf32>
    %2 = tpu.matmul %0, %1, %cst {dimension_numbers = #tpu.dot_dimension_numbers<[1], [0], [0], [1], [0, 0, 1, 1], [], []>} : vector<16x16xf32>, vector<16x32xf32>, vector<16x32xf32> -> vector<16x32xf32>
    %c0_3 = arith.constant 0 : index
    %c0_4 = arith.constant 0 : index
    %c0_5 = arith.constant 0 : index
    %3 = vector.load %arg2[%c0_3, %c0_4, %c0_5] : memref<5x32x32xf32, #tpu.memory_space<vmem>>, vector<1x32x32xf32>
    %4 = vector.shape_cast %3 : vector<1x32x32xf32> to vector<32x32xf32>
    %cst_6 = arith.constant dense<0.000000e+00> : vector<16x32xf32>
    %5 = tpu.matmul %2, %4, %cst_6 {dimension_numbers = #tpu.dot_dimension_numbers<[1], [0], [0], [1], [0, 0, 1, 1], [], []>} : vector<16x32xf32>, vector<32x32xf32>, vector<16x32xf32> -> vector<16x32xf32>
    %c0_7 = arith.constant 0 : index
    %c0_8 = arith.constant 0 : index
    %c0_9 = arith.constant 0 : index
    %6 = vector.load %arg3[%c0_7, %c0_8, %c0_9] : memref<5x32x32xf32, #tpu.memory_space<vmem>>, vector<1x32x32xf32>
    %7 = vector.shape_cast %6 : vector<1x32x32xf32> to vector<32x32xf32>
    %cst_10 = arith.constant dense<0.000000e+00> : vector<16x32xf32>
    %8 = tpu.matmul %1, %7, %cst_10 {dimension_numbers = #tpu.dot_dimension_numbers<[1], [0], [0], [1], [0, 0, 1, 1], [], []>} : vector<16x32xf32>, vector<32x32xf32>, vector<16x32xf32> -> vector<16x32xf32>
    %9 = arith.addf %5, %8 : vector<16x32xf32>
    %c0_11 = arith.constant 0 : index
    %c0_12 = arith.constant 0 : index
    %10 = vector.load %arg4[%c0_11, %c0_12] : memref<5x32xf32, #tpu.memory_space<vmem>>, vector<1x32xf32>
    %11 = vector.broadcast %10 : vector<1x32xf32> to vector<16x32xf32>
    %12 = arith.addf %9, %11 : vector<16x32xf32>
    %cst_13 = arith.constant 0.000000e+00 : f32
    %13 = vector.broadcast %cst_13 : f32 to vector<16x32xf32>
    %14 = arith.maximumf %12, %13 : vector<16x32xf32>
    %cst_14 = arith.constant dense<0.000000e+00> : vector<16x32xf32>
    %15 = tpu.matmul %0, %14, %cst_14 {dimension_numbers = #tpu.dot_dimension_numbers<[1], [0], [0], [1], [0, 0, 1, 1], [], []>} : vector<16x16xf32>, vector<16x32xf32>, vector<16x32xf32> -> vector<16x32xf32>
    %c1 = arith.constant 1 : index
    %c0_15 = arith.constant 0 : index
    %c0_16 = arith.constant 0 : index
    %16 = vector.load %arg2[%c1, %c0_15, %c0_16] : memref<5x32x32xf32, #tpu.memory_space<vmem>>, vector<1x32x32xf32>
    %17 = vector.shape_cast %16 : vector<1x32x32xf32> to vector<32x32xf32>
    %cst_17 = arith.constant dense<0.000000e+00> : vector<16x32xf32>
    %18 = tpu.matmul %15, %17, %cst_17 {dimension_numbers = #tpu.dot_dimension_numbers<[1], [0], [0], [1], [0, 0, 1, 1], [], []>} : vector<16x32xf32>, vector<32x32xf32>, vector<16x32xf32> -> vector<16x32xf32>
    %c1_18 = arith.constant 1 : index
    %c0_19 = arith.constant 0 : index
    %c0_20 = arith.constant 0 : index
    %19 = vector.load %arg3[%c1_18, %c0_19, %c0_20] : memref<5x32x32xf32, #tpu.memory_space<vmem>>, vector<1x32x32xf32>
    %20 = vector.shape_cast %19 : vector<1x32x32xf32> to vector<32x32xf32>
    %cst_21 = arith.constant dense<0.000000e+00> : vector<16x32xf32>
    %21 = tpu.matmul %14, %20, %cst_21 {dimension_numbers = #tpu.dot_dimension_numbers<[1], [0], [0], [1], [0, 0, 1, 1], [], []>} : vector<16x32xf32>, vector<32x32xf32>, vector<16x32xf32> -> vector<16x32xf32>
    %22 = arith.addf %18, %21 : vector<16x32xf32>
    %c1_22 = arith.constant 1 : index
    %c0_23 = arith.constant 0 : index
    %23 = vector.load %arg4[%c1_22, %c0_23] : memref<5x32xf32, #tpu.memory_space<vmem>>, vector<1x32xf32>
    %24 = vector.broadcast %23 : vector<1x32xf32> to vector<16x32xf32>
    %25 = arith.addf %22, %24 : vector<16x32xf32>
    %cst_24 = arith.constant 0.000000e+00 : f32
    %26 = vector.broadcast %cst_24 : f32 to vector<16x32xf32>
    %27 = arith.maximumf %25, %26 : vector<16x32xf32>
    %28 = arith.addf %27, %14 : vector<16x32xf32>
    %cst_25 = arith.constant dense<0.000000e+00> : vector<16x32xf32>
    %29 = tpu.matmul %0, %28, %cst_25 {dimension_numbers = #tpu.dot_dimension_numbers<[1], [0], [0], [1], [0, 0, 1, 1], [], []>} : vector<16x16xf32>, vector<16x32xf32>, vector<16x32xf32> -> vector<16x32xf32>
    %c2 = arith.constant 2 : index
    %c0_26 = arith.constant 0 : index
    %c0_27 = arith.constant 0 : index
    %30 = vector.load %arg2[%c2, %c0_26, %c0_27] : memref<5x32x32xf32, #tpu.memory_space<vmem>>, vector<1x32x32xf32>
    %31 = vector.shape_cast %30 : vector<1x32x32xf32> to vector<32x32xf32>
    %cst_28 = arith.constant dense<0.000000e+00> : vector<16x32xf32>
    %32 = tpu.matmul %29, %31, %cst_28 {dimension_numbers = #tpu.dot_dimension_numbers<[1], [0], [0], [1], [0, 0, 1, 1], [], []>} : vector<16x32xf32>, vector<32x32xf32>, vector<16x32xf32> -> vector<16x32xf32>
    %c2_29 = arith.constant 2 : index
    %c0_30 = arith.constant 0 : index
    %c0_31 = arith.constant 0 : index
    %33 = vector.load %arg3[%c2_29, %c0_30, %c0_31] : memref<5x32x32xf32, #tpu.memory_space<vmem>>, vector<1x32x32xf32>
    %34 = vector.shape_cast %33 : vector<1x32x32xf32> to vector<32x32xf32>
    %cst_32 = arith.constant dense<0.000000e+00> : vector<16x32xf32>
    %35 = tpu.matmul %28, %34, %cst_32 {dimension_numbers = #tpu.dot_dimension_numbers<[1], [0], [0], [1], [0, 0, 1, 1], [], []>} : vector<16x32xf32>, vector<32x32xf32>, vector<16x32xf32> -> vector<16x32xf32>
    %36 = arith.addf %32, %35 : vector<16x32xf32>
    %c2_33 = arith.constant 2 : index
    %c0_34 = arith.constant 0 : index
    %37 = vector.load %arg4[%c2_33, %c0_34] : memref<5x32xf32, #tpu.memory_space<vmem>>, vector<1x32xf32>
    %38 = vector.broadcast %37 : vector<1x32xf32> to vector<16x32xf32>
    %39 = arith.addf %36, %38 : vector<16x32xf32>
    %cst_35 = arith.constant 0.000000e+00 : f32
    %40 = vector.broadcast %cst_35 : f32 to vector<16x32xf32>
    %41 = arith.maximumf %39, %40 : vector<16x32xf32>
    %42 = arith.addf %41, %28 : vector<16x32xf32>
    %cst_36 = arith.constant dense<0.000000e+00> : vector<16x32xf32>
    %43 = tpu.matmul %0, %42, %cst_36 {dimension_numbers = #tpu.dot_dimension_numbers<[1], [0], [0], [1], [0, 0, 1, 1], [], []>} : vector<16x16xf32>, vector<16x32xf32>, vector<16x32xf32> -> vector<16x32xf32>
    %c3 = arith.constant 3 : index
    %c0_37 = arith.constant 0 : index
    %c0_38 = arith.constant 0 : index
    %44 = vector.load %arg2[%c3, %c0_37, %c0_38] : memref<5x32x32xf32, #tpu.memory_space<vmem>>, vector<1x32x32xf32>
    %45 = vector.shape_cast %44 : vector<1x32x32xf32> to vector<32x32xf32>
    %cst_39 = arith.constant dense<0.000000e+00> : vector<16x32xf32>
    %46 = tpu.matmul %43, %45, %cst_39 {dimension_numbers = #tpu.dot_dimension_numbers<[1], [0], [0], [1], [0, 0, 1, 1], [], []>} : vector<16x32xf32>, vector<32x32xf32>, vector<16x32xf32> -> vector<16x32xf32>
    %c3_40 = arith.constant 3 : index
    %c0_41 = arith.constant 0 : index
    %c0_42 = arith.constant 0 : index
    %47 = vector.load %arg3[%c3_40, %c0_41, %c0_42] : memref<5x32x32xf32, #tpu.memory_space<vmem>>, vector<1x32x32xf32>
    %48 = vector.shape_cast %47 : vector<1x32x32xf32> to vector<32x32xf32>
    %cst_43 = arith.constant dense<0.000000e+00> : vector<16x32xf32>
    %49 = tpu.matmul %42, %48, %cst_43 {dimension_numbers = #tpu.dot_dimension_numbers<[1], [0], [0], [1], [0, 0, 1, 1], [], []>} : vector<16x32xf32>, vector<32x32xf32>, vector<16x32xf32> -> vector<16x32xf32>
    %50 = arith.addf %46, %49 : vector<16x32xf32>
    %c3_44 = arith.constant 3 : index
    %c0_45 = arith.constant 0 : index
    %51 = vector.load %arg4[%c3_44, %c0_45] : memref<5x32xf32, #tpu.memory_space<vmem>>, vector<1x32xf32>
    %52 = vector.broadcast %51 : vector<1x32xf32> to vector<16x32xf32>
    %53 = arith.addf %50, %52 : vector<16x32xf32>
    %cst_46 = arith.constant 0.000000e+00 : f32
    %54 = vector.broadcast %cst_46 : f32 to vector<16x32xf32>
    %55 = arith.maximumf %53, %54 : vector<16x32xf32>
    %56 = arith.addf %55, %42 : vector<16x32xf32>
    %cst_47 = arith.constant dense<0.000000e+00> : vector<16x32xf32>
    %57 = tpu.matmul %0, %56, %cst_47 {dimension_numbers = #tpu.dot_dimension_numbers<[1], [0], [0], [1], [0, 0, 1, 1], [], []>} : vector<16x16xf32>, vector<16x32xf32>, vector<16x32xf32> -> vector<16x32xf32>
    %c4 = arith.constant 4 : index
    %c0_48 = arith.constant 0 : index
    %c0_49 = arith.constant 0 : index
    %58 = vector.load %arg2[%c4, %c0_48, %c0_49] : memref<5x32x32xf32, #tpu.memory_space<vmem>>, vector<1x32x32xf32>
    %59 = vector.shape_cast %58 : vector<1x32x32xf32> to vector<32x32xf32>
    %cst_50 = arith.constant dense<0.000000e+00> : vector<16x32xf32>
    %60 = tpu.matmul %57, %59, %cst_50 {dimension_numbers = #tpu.dot_dimension_numbers<[1], [0], [0], [1], [0, 0, 1, 1], [], []>} : vector<16x32xf32>, vector<32x32xf32>, vector<16x32xf32> -> vector<16x32xf32>
    %c4_51 = arith.constant 4 : index
    %c0_52 = arith.constant 0 : index
    %c0_53 = arith.constant 0 : index
    %61 = vector.load %arg3[%c4_51, %c0_52, %c0_53] : memref<5x32x32xf32, #tpu.memory_space<vmem>>, vector<1x32x32xf32>
    %62 = vector.shape_cast %61 : vector<1x32x32xf32> to vector<32x32xf32>
    %cst_54 = arith.constant dense<0.000000e+00> : vector<16x32xf32>
    %63 = tpu.matmul %56, %62, %cst_54 {dimension_numbers = #tpu.dot_dimension_numbers<[1], [0], [0], [1], [0, 0, 1, 1], [], []>} : vector<16x32xf32>, vector<32x32xf32>, vector<16x32xf32> -> vector<16x32xf32>
    %64 = arith.addf %60, %63 : vector<16x32xf32>
    %c4_55 = arith.constant 4 : index
    %c0_56 = arith.constant 0 : index
    %65 = vector.load %arg4[%c4_55, %c0_56] : memref<5x32xf32, #tpu.memory_space<vmem>>, vector<1x32xf32>
    %66 = vector.broadcast %65 : vector<1x32xf32> to vector<16x32xf32>
    %67 = arith.addf %64, %66 : vector<16x32xf32>
    %68 = arith.addf %67, %56 : vector<16x32xf32>
    %c0_57 = arith.constant 0 : index
    %c0_58 = arith.constant 0 : index
    %69 = vector.load %arg5[%c0_57, %c0_58] : memref<16x32xf32, #tpu.memory_space<vmem>>, vector<16x32xf32>
    tpu.vector_store %arg5[%c0_57, %c0_58], %68 {strides = array<i32>} : memref<16x32xf32, #tpu.memory_space<vmem>>, vector<16x32xf32>,
    return
  }
}

</mosaic_0001>

<bundles_post_ra>
// kernel: gnn_forward.1
= control target key start
LH: loop header
LB: loop body
LE: loop exit
PB: predicated region body
PF: predicated region fallthrough
CT: control target
= control target key end

     0   :  { %10 = vsyncpa [#allocation3], 0  ;;  %s824_s0 = inlined_call_operand.vmem [shape: f32[16,16], index: 0, kind: input, shape index: {}]   ;;  %s825_s1 = inlined_call_operand.vmem [shape: f32[16,32], index: 1, kind: input, shape index: {}]   ;;  %s826_s2 = inlined_call_operand.hbm [shape: f32[5,32,32], index: 2, kind: input, shape index: {}]   ;;  %s827_s3 = inlined_call_operand.hbm [shape: f32[5,32,32], index: 3, kind: input, shape index: {}]   ;;  %s828_s4 = inlined_call_operand.vmem [shape: f32[5,32], index: 4, kind: input, shape index: {}]   ;;  %s829_s5 = inlined_call_operand.hbm [shape: f32[16,32], index: 5, kind: output, shape index: {}]  }
   0x1   :  { %11 = vsyncpa [#allocation6], 0 }
   0x2   :  { %12 = vsyncpa [#allocation4], 0  ;;  %s21_s20 = sshll.u32 %s826_s2, 4  ;;  %s698_s21 = smov [#allocation2]   ;;  %s22_s20 = int_to_ptr.hbm [resolvable:$true] %s21_s20 }
   0x3   :  { %s23_s22 = sshll.u32 %s698_s21, 4  ;;  %s34_s25 = sshll.u32 %s827_s3, 4  ;;  %s24_s22 = int_to_ptr.vmem [resolvable:$true] %s23_s22  ;;  %s35_s25 = int_to_ptr.hbm [resolvable:$true] %s34_s25 }
   0x4   :  { %s699_s26 = smov 128   ;;  %s700_s27 = smov 8  }
   0x5   :  { %29 = dma.hbm_to_vmem [thread:$0]  %s22_s20, 2560, %s24_s22, [#allocation3], %s699_s26, %s699_s26, %s700_s27  }
   0x6   :  { %s701_s28 = smov [#allocation5]  }
   0x7   :  { %s36_s29 = sshll.u32 %s701_s28, 4  ;;  %s37_s29 = int_to_ptr.vmem [resolvable:$true] %s36_s29 }
   0x8   :  { %42 = dma.hbm_to_vmem [thread:$0]  %s35_s25, 2560, %s37_s29, [#allocation6], %s699_s26, %s699_s26, %s700_s27  }
   0x9   :  { %692 = dma.done.wait [#allocation3], 2560  }
   0xa   :  { %693 = vsyncadd [#allocation3], 4294964736 }
   0xb   :  { %694 = dma.done.wait [#allocation6], 2560  }
   0xc   :  { %695 = vsyncadd [#allocation6], 4294964736  ;;  %v56_v0 = vld [vmem:[%s825_s1 + $0x8] sm:$0xff]  ;;  %v55_v1 = vld [vmem:[%s825_s1] sm:$0xff]  ;;  %vm57_vm0 = vcmask 130048   ;;  %vm95_vm1 = vcmask 261120  }
   0xd   :  { %78 = vmatpush.msra.mxu0 %v56_v0  ;;  %v754_v2 = vld [vmem:[%s824_s0] sm:$0xff]  ;;  %v94_v3 = vld [vmem:[#allocation5 + $0x18] sm:$0xff]  ;;  %v93_v4 = vld [vmem:[#allocation5 + $0x10] sm:$0xff]  ;;  %s702_s19 = smov [#allocation7]   ;;  %s562_s23 = sshll.u32 %s829_s5, 4  ;;  %s563_s23 = int_to_ptr.hbm [resolvable:$true] %s562_s23 }
   0xe   :  { %606 = vmatpush.msra.mxu2 %v94_v3  ;;  %114 = vmatpush.msra.mxu1 %v94_v3  ;;  %v92_v5 = vld [vmem:[#allocation5 + $0x8] sm:$0xff]  ;;  %v91_v6 = vld [vmem:[#allocation5] sm:$0xff]  ;;  %v90_v7 = vld [vmem:[#allocation2 + $0x18] sm:$0xff]  ;;  %s560_s20 = sshll.u32 %s702_s19, 4  ;;  %s561_s20 = int_to_ptr.vmem [resolvable:$true] %s560_s20 }
   0xf   :  { %79 = vmatpush.msra.mxu0 %v55_v1  ;;  %v761_v8 = vld [vmem:[%s824_s0 + $0x8] sm:$0xff]  ;;  %v89_v9 = vld [vmem:[#allocation2 + $0x10] sm:$0xff]  ;;  %v87_v11 = vld [vmem:[#allocation2] sm:$0xff] }
  0x10   :  { %576 = vmatmul.msk.f32.vlgmr.msra.gmra.mxu0 %vm57_vm0, %v754_v2  ;;  %607 = vmatpush.msra.mxu2 %v93_v4  ;;  %v88_v10 = vld [vmem:[#allocation2 + $0x8] sm:$0xff]  ;;  %v192_v14 = vld [vmem:[#allocation5 + $0x38] sm:$0xff]  ;;  %v191_v15 = vld [vmem:[#allocation5 + $0x30] sm:$0xff] }
  0x11   :  { %115 = vmatpush.msra.mxu1 %v93_v4  ;;  %211 = vmatpush.msrb.mxu0 %v192_v14  ;;  %v190_v16 = vld [vmem:[#allocation5 + $0x28] sm:$0xff]  ;;  %v189_v17 = vld [vmem:[#allocation5 + $0x20] sm:$0xff]  ;;  %v187_v29 = vld [vmem:[#allocation2 + $0x38] sm:$0xff] }
  0x12   :  { %608 = vmatpush.msra.mxu2 %v92_v5  ;;  %v615_v20 = vld [vmem:[%s828_s4] ss:$0 sm:$0xff]  ;;  %v186_v30 = vld [vmem:[#allocation2 + $0x30] sm:$0xff]  ;;  %v185_v31 = vld [vmem:[#allocation2 + $0x28] sm:$0xff] }
  0x13   :  { %116 = vmatpush.msra.mxu1 %v92_v5  ;;  %212 = vmatpush.msrb.mxu0 %v191_v15  ;;  %v184_v32 = vld [vmem:[#allocation2 + $0x20] sm:$0xff]  ;;  %v291_v35 = vld [vmem:[#allocation5 + $0x58] sm:$0xff]  ;;  %v290_v36 = vld [vmem:[#allocation5 + $0x50] sm:$0xff] }
  0x14   :  { %609 = vmatpush.msra.mxu2 %v91_v6  ;;  %v289_v37 = vld [vmem:[#allocation5 + $0x48] sm:$0xff]  ;;  %v288_v38 = vld [vmem:[#allocation5 + $0x40] sm:$0xff]  ;;  %v286_v39 = vld [vmem:[#allocation2 + $0x58] sm:$0xff] }
  0x15   :  { %579 = vmatmul.msk.f32.vlgmr.msra.gmra.mxu2 %vm95_vm1, %v56_v0  ;;  %117 = vmatpush.msra.mxu1 %v91_v6  ;;  %v616_v41 = vld [vmem:[%s828_s4 + $0x1] ss:$0 sm:$0xff]  ;;  %v285_v53 = vld [vmem:[#allocation2 + $0x50] sm:$0xff]  ;;  %v284_v54 = vld [vmem:[#allocation2 + $0x48] sm:$0xff] }
  0x16   :  { %143 = vmatpush.msrb.mxu2 %v90_v7  ;;  %578 = vmatmul.msk.f32.vlgmr.msra.gmra.mxu1 %vm95_vm1, %v55_v1  ;;  %v283_v55 = vld [vmem:[#allocation2 + $0x40] sm:$0xff]  ;;  %v390_v58 = vld [vmem:[#allocation5 + $0x78] sm:$0xff]  ;;  %v389_v59 = vld [vmem:[#allocation5 + $0x70] sm:$0xff] }
  0x17   :  { %213 = vmatpush.msrb.mxu0 %v190_v16  ;;  %v388_v60 = vld [vmem:[#allocation5 + $0x68] sm:$0xff]  ;;  %v387_v61 = vld [vmem:[#allocation5 + $0x60] sm:$0xff]  ;;  %v384_v14 = vld [vmem:[#allocation2 + $0x70] sm:$0xff] }
  0x18   :  { %577 = vmatmul.msk.f32.gmra.mxu0 %vm57_vm0, %v761_v8  ;;  %144 = vmatpush.msrb.mxu2 %v89_v9  ;;  %v617_v63 = vld [vmem:[%s828_s4 + $0x2] ss:$0 sm:$0xff]  ;;  %v383_v15 = vld [vmem:[#allocation2 + $0x68] sm:$0xff] }
  0x19   :  { %214 = vmatpush.msrb.mxu0 %v189_v17  ;;  %v382_v16 = vld [vmem:[#allocation2 + $0x60] sm:$0xff] }
  0x1a   :  { %145 = vmatpush.msrb.mxu2 %v88_v10 }
  0x1b   :  { %339 = vmatpush.msra.mxu0 %v286_v39  ;;  %v481_v39 = vld [vmem:[#allocation2 + $0x80] sm:$0xff] }
  0x1c   :  { %146 = vmatpush.msrb.mxu2 %v87_v11 }
  0x1d   :  { %340 = vmatpush.msra.mxu0 %v285_v53 }
  0x1e   :  { %310 = vmatpush.msra.mxu2 %v291_v35 }
  0x1f   :  { %341 = vmatpush.msra.mxu0 %v284_v54 }
  0x20   :  { %311 = vmatpush.msra.mxu2 %v290_v36 }
  0x21   :  { %342 = vmatpush.msra.mxu0 %v283_v55 }
  0x22   :  { %312 = vmatpush.msra.mxu2 %v289_v37  ;;  %v483_v37 = vld [vmem:[#allocation2 + $0x90] sm:$0xff] }
  0x24   :  { %313 = vmatpush.msra.mxu2 %v288_v38  ;;  %v482_v38 = vld [vmem:[#allocation2 + $0x88] sm:$0xff] }
  0x8d   :  { %v81_v12 = vpop.f32.mrf.mxu0 }
  0x8e   :  { %580 = vmatmul.msk.f32.vlgmr.msrb.gmra.mxu2 %vm95_vm1, %v81_v12 }
  0x93   :  { %v119_v19 = vpop.f32.mrf.mxu1 }
  0x95   :  { %v84_v13 = vpop.f32.mrf.mxu0 }
  0x96   :  { %581 = vmatmul.msk.f32.gmra.mxu2 %vm95_vm1, %v84_v13  ;;  %v385_v13 = vld [vmem:[#allocation2 + $0x78] sm:$0xff] }
  0x97   :  { %438 = vmatpush.msrb.mxu2 %v385_v13 }
  0x98   :  { %v122_v18 = vpop.f32.mrf.mxu2 }
  0x99   :  { %439 = vmatpush.msrb.mxu2 %v384_v14 }
  0x9b   :  { %440 = vmatpush.msrb.mxu2 %v383_v15 }
  0x9d   :  { %441 = vmatpush.msrb.mxu2 %v382_v16 }
 0x111   :  { %v148_v21 = vpop.f32.mrf.mxu2 }
 0x112   :  { %v149_v22 = vadd.f32 %v148_v21, %v119_v19  ;;  %v489_v19 = vld [vmem:[#allocation5 + $0x98] sm:$0xff]  ;;  %v487_v21 = vld [vmem:[#allocation5 + $0x88] sm:$0xff] }
 0x114   :  { %v156_v23 = vadd.f32 %v615_v20, %v149_v22  ;;  %v486_v22 = vld [vmem:[#allocation5 + $0x80] sm:$0xff] }
 0x116   :  { %v158_v24 = vmax.f32 %v156_v23, 0.0  ;;  %v484_v23 = vld [vmem:[#allocation2 + $0x98] sm:$0xff] }
 0x118   :  { %584 = vmatmul.msk.f32.vlgmr.msrb.gmra.mxu0 %vm95_vm1, %v158_v24 }
 0x119   :  { %v151_v25 = vpop.f32.mrf.mxu2 }
 0x11a   :  { %v152_v26 = vadd.f32 %v151_v25, %v122_v18  ;;  %v618_v25 = vld [vmem:[%s828_s4 + $0x3] ss:$0 sm:$0xff] }
 0x11c   :  { %v157_v27 = vadd.f32 %v615_v20, %v152_v26  ;;  %v488_v20 = vld [vmem:[#allocation5 + $0x90] sm:$0xff] }
 0x11e   :  { %v159_v28 = vmax.f32 %v157_v27, 0.0 }
 0x120   :  { %174 = vmatpush.msra.mxu3 %v159_v28  ;;  %585 = vmatmul.msk.f32.gmra.mxu0 %vm95_vm1, %v159_v28 }
 0x122   :  { %175 = vmatpush.msra.mxu3 %v158_v24 }
 0x123   :  { %582 = vmatmul.msk.f32.vlgmr.msra.gmra.mxu3 %vm57_vm0, %v754_v2 }
 0x124   :  { %240 = vmatpush.msrb.mxu3 %v187_v29 }
 0x126   :  { %241 = vmatpush.msrb.mxu3 %v186_v30 }
 0x128   :  { %242 = vmatpush.msrb.mxu3 %v185_v31 }
 0x12a   :  { %243 = vmatpush.msrb.mxu3 %v184_v32 }
 0x12b   :  { %583 = vmatmul.msk.f32.gmra.mxu3 %vm57_vm0, %v761_v8 }
 0x195   :  { %v216_v40 = vpop.f32.mrf.mxu0 }
 0x19d   :  { %v219_v47 = vpop.f32.mrf.mxu0 }
 0x1a6   :  { %v177_v33 = vpop.f32.mrf.mxu3 }
 0x1a7   :  { %586 = vmatmul.msk.f32.vlgmr.msrb.gmra.mxu3 %vm95_vm1, %v177_v33 }
 0x1ae   :  { %v180_v34 = vpop.f32.mrf.mxu3 }
 0x1af   :  { %587 = vmatmul.msk.f32.gmra.mxu3 %vm95_vm1, %v180_v34 }
 0x22a   :  { %v245_v42 = vpop.f32.mrf.mxu3 }
 0x22b   :  { %v246_v43 = vadd.f32 %v245_v42, %v216_v40 }
 0x22d   :  { %v253_v44 = vadd.f32 %v616_v41, %v246_v43 }
 0x22f   :  { %v255_v45 = vmax.f32 %v253_v44, 0.0 }
 0x231   :  { %v257_v46 = vadd.f32 %v255_v45, %v158_v24 }
 0x232   :  { %v248_v48 = vpop.f32.mrf.mxu3 }
 0x233   :  { %v249_v49 = vadd.f32 %v248_v48, %v219_v47  ;;  %590 = vmatmul.msk.f32.vlgmr.msra.gmra.mxu2 %vm95_vm1, %v257_v46 }
 0x235   :  { %v254_v50 = vadd.f32 %v616_v41, %v249_v49 }
 0x237   :  { %v256_v51 = vmax.f32 %v254_v50, 0.0 }
 0x239   :  { %v258_v52 = vadd.f32 %v256_v51, %v159_v28 }
 0x23b   :  { %273 = vmatpush.msrb.mxu1 %v258_v52  ;;  %591 = vmatmul.msk.f32.gmra.mxu2 %vm95_vm1, %v258_v52 }
 0x23d   :  { %274 = vmatpush.msrb.mxu1 %v257_v46 }
 0x23e   :  { %588 = vmatmul.msk.f32.vlgmr.msrb.gmra.mxu1 %vm57_vm0, %v754_v2 }
 0x23f   :  { %409 = vmatpush.msra.mxu1 %v390_v58 }
 0x241   :  { %410 = vmatpush.msra.mxu1 %v389_v59 }
 0x243   :  { %411 = vmatpush.msra.mxu1 %v388_v60 }
 0x245   :  { %412 = vmatpush.msra.mxu1 %v387_v61 }
 0x246   :  { %589 = vmatmul.msk.f32.gmra.mxu1 %vm57_vm0, %v761_v8 }
 0x247   :  { %537 = vmatpush.msrb.mxu1 %v484_v23 }
 0x249   :  { %538 = vmatpush.msrb.mxu1 %v483_v37 }
 0x24b   :  { %539 = vmatpush.msrb.mxu1 %v482_v38 }
 0x24d   :  { %540 = vmatpush.msrb.mxu1 %v481_v39 }
 0x2b6   :  { %v315_v62 = vpop.f32.mrf.mxu2 }
 0x2bb   :  { %v276_v56 = vpop.f32.mrf.mxu1 }
 0x2bc   :  { %592 = vmatmul.msk.f32.vlgmr.msra.gmra.mxu0 %vm95_vm1, %v276_v56 }
 0x2be   :  { %v318_v6 = vpop.f32.mrf.mxu2 }
 0x2c3   :  { %v279_v57 = vpop.f32.mrf.mxu1 }
 0x2c4   :  { %593 = vmatmul.msk.f32.gmra.mxu0 %vm95_vm1, %v279_v57 }
 0x339   :  { %v344_v0 = vpop.f32.mrf.mxu0 }
 0x33a   :  { %v345_v1 = vadd.f32 %v344_v0, %v315_v62 }
 0x33c   :  { %v352_v3 = vadd.f32 %v617_v63, %v345_v1 }
 0x33e   :  { %v354_v4 = vmax.f32 %v352_v3, 0.0 }
 0x340   :  { %v356_v5 = vadd.f32 %v354_v4, %v257_v46 }
 0x341   :  { %v347_v7 = vpop.f32.mrf.mxu0 }
 0x342   :  { %v348_v9 = vadd.f32 %v347_v7, %v318_v6  ;;  %596 = vmatmul.msk.f32.vlgmr.msra.gmra.mxu1 %vm95_vm1, %v356_v5 }
 0x344   :  { %v353_v10 = vadd.f32 %v617_v63, %v348_v9 }
 0x346   :  { %v355_v11 = vmax.f32 %v353_v10, 0.0 }
 0x348   :  { %v357_v12 = vadd.f32 %v355_v11, %v258_v52 }
 0x34a   :  { %372 = vmatpush.msra.mxu3 %v357_v12  ;;  %597 = vmatmul.msk.f32.gmra.mxu1 %vm95_vm1, %v357_v12 }
 0x34c   :  { %373 = vmatpush.msra.mxu3 %v356_v5 }
 0x34d   :  { %594 = vmatmul.msk.f32.vlgmr.msra.gmra.mxu3 %vm57_vm0, %v754_v2 }
 0x34e   :  { %508 = vmatpush.msrb.mxu3 %v489_v19 }
 0x350   :  { %509 = vmatpush.msrb.mxu3 %v488_v20 }
 0x352   :  { %510 = vmatpush.msrb.mxu3 %v487_v21 }
 0x354   :  { %511 = vmatpush.msrb.mxu3 %v486_v22 }
 0x355   :  { %595 = vmatmul.msk.f32.gmra.mxu3 %vm57_vm0, %v761_v8 }
 0x3bf   :  { %v414_v24 = vpop.f32.mrf.mxu1 }
 0x3c7   :  { %v417_v31 = vpop.f32.mrf.mxu1 }
 0x3d0   :  { %v375_v17 = vpop.f32.mrf.mxu3 }
 0x3d1   :  { %598 = vmatmul.msk.f32.vlgmr.msrb.gmra.mxu2 %vm95_vm1, %v375_v17 }
 0x3d8   :  { %v378_v18 = vpop.f32.mrf.mxu3 }
 0x3d9   :  { %599 = vmatmul.msk.f32.gmra.mxu2 %vm95_vm1, %v378_v18 }
 0x454   :  { %v443_v26 = vpop.f32.mrf.mxu2 }
 0x455   :  { %v444_v27 = vadd.f32 %v443_v26, %v414_v24 }
 0x457   :  { %v451_v28 = vadd.f32 %v618_v25, %v444_v27 }
 0x459   :  { %v453_v29 = vmax.f32 %v451_v28, 0.0 }
 0x45b   :  { %v455_v30 = vadd.f32 %v453_v29, %v356_v5 }
 0x45c   :  { %v446_v32 = vpop.f32.mrf.mxu2 }
 0x45d   :  { %v447_v33 = vadd.f32 %v446_v32, %v417_v31  ;;  %602 = vmatmul.msk.f32.vlgmr.msrb.gmra.mxu3 %vm95_vm1, %v455_v30 }
 0x45f   :  { %v452_v34 = vadd.f32 %v618_v25, %v447_v33 }
 0x461   :  { %v454_v35 = vmax.f32 %v452_v34, 0.0 }
 0x463   :  { %v456_v36 = vadd.f32 %v454_v35, %v357_v12 }
 0x465   :  { %471 = vmatpush.msrb.mxu0 %v456_v36  ;;  %603 = vmatmul.msk.f32.gmra.mxu3 %vm95_vm1, %v456_v36 }
 0x467   :  { %472 = vmatpush.msrb.mxu0 %v455_v30 }
 0x468   :  { %600 = vmatmul.msk.f32.vlgmr.msrb.gmra.mxu0 %vm57_vm0, %v754_v2  ;;  %v619_v2 = vld [vmem:[%s828_s4 + $0x4] ss:$0 sm:$0xff] }
 0x470   :  { %601 = vmatmul.msk.f32.gmra.mxu0 %vm57_vm0, %v761_v8 }
 0x4e0   :  { %v513_v42 = vpop.f32.mrf.mxu3 }
 0x4e5   :  { %v474_v40 = vpop.f32.mrf.mxu0 }
 0x4e6   :  { %604 = vmatmul.msk.f32.vlgmr.msrb.gmra.mxu1 %vm95_vm1, %v474_v40 }
 0x4e8   :  { %v516_v46 = vpop.f32.mrf.mxu3 }
 0x4ed   :  { %v477_v41 = vpop.f32.mrf.mxu0 }
 0x4ee   :  { %605 = vmatmul.msk.f32.gmra.mxu1 %vm95_vm1, %v477_v41 }
 0x563   :  { %v542_v43 = vpop.f32.mrf.mxu1 }
 0x564   :  { %v543_v44 = vadd.f32 %v542_v43, %v513_v42 }
 0x566   :  { %v550_v8 = vadd.f32 %v619_v2, %v543_v44 }
 0x568   :  { %v552_v45 = vadd.f32 %v550_v8, %v455_v30 }
 0x56a   :  { %554 = vst.msk [vmem:[#allocation7] sm:$0xff] %vm95_vm1, %v552_v45 }
 0x56b   :  { %v545_v47 = vpop.f32.mrf.mxu1 }
 0x56c   :  { %v546_v48 = vadd.f32 %v545_v47, %v516_v46 }
 0x56e   :  { %v551_v49 = vadd.f32 %v619_v2, %v546_v48 }
 0x570   :  { %v553_v50 = vadd.f32 %v551_v49, %v456_v36 }
 0x572   :  { %555 = vst.msk [vmem:[#allocation7 + $0x8] sm:$0xff] %vm95_vm1, %v553_v50 }
 0x573   :  { %568 = dma.vmem_to_hbm [thread:$0]  %s561_s20, 256, %s563_s23, [#allocation4], %s699_s26, %s699_s26, %s700_s27  }
 0x574   :  { %696 = dma.done.wait [#allocation4], 256  }
 0x575   :  { %697 = vsyncadd [#allocation4], 4294967040 }
 0x576   :  { %573 = vsyncpa [#allocation3], 1 }
 0x577   :  { %574 = vsyncpa [#allocation6], 1 }
 0x578   :  { %575 = vsyncpa [#allocation4], 1 }

</bundles_post_ra>
